<compile_context>
chip_gen: v7x
topology: tpu7x:2x2x1
jax: 0.10.0
libtpu: 0.0.40
codegen_flags: <defaults>
</compile_context>

<pallas_src>
import functools

import jax
import jax.numpy as jnp
import numpy as np
from jax import lax
from jax.experimental import pallas as pl
from jax.experimental.pallas import tpu as pltpu


def rnn_chunk_kernel(xproj_ref, whh_ref, h_out_ref, h_scratch, *,
                     seq_len, chunk, unroll):
    """One grid step runs `chunk` (or the tail) timesteps for one batch tile.

    Grid = (batch_tiles [parallel], time_chunks [arbitrary]).

    xproj_ref : (chunk, TB, H) f32   precomputed x_t @ W_ih^T + b_ih + b_hh
    whh_ref   : (H, H)        bf16   W_hh^T, resident across the grid
    h_out_ref : (TB, H)       f32    final hidden state for this batch tile
    h_scratch : (TB, H)       f32    hidden-state carry across time chunks
    """
    c = pl.program_id(1)
    n_chunks = pl.num_programs(1)

    @pl.when(c == 0)
    def _():
        h_scratch[...] = jnp.zeros_like(h_scratch)

    # bf16 W_hh^T, hoisted out of the time loop (8 vregs at H=128).
    # TODO(synk): at H >= 256 feed whh_ref[...] to the dot directly (or use
    # pltpu.matmul_push_rhs once per chunk) to avoid vreg spills and keep the
    # weight stationary in the MXU.
    whh = whh_ref[...]

    def step(i, h):
        # h stays in vregs across the chunk; only the dot LHS is cast to bf16,
        # the add + tanh stay f32 (v5e VPU/EUP have no bf16), acc is f32.
        z = xproj_ref[i] + jnp.dot(
            h.astype(whh.dtype), whh, preferred_element_type=jnp.float32)
        return jnp.tanh(z)

    tail = seq_len % chunk  # static

    if tail == 0:
        h = lax.fori_loop(0, chunk, step, h_scratch[...], unroll=unroll)
        h_scratch[...] = h

        @pl.when(c == n_chunks - 1)
        def _():
            h_out_ref[...] = h  # lane-dense (TB, H) store
    else:
        # Only the last time chunk is padded: full chunks run unmasked, the
        # last chunk runs exactly `tail` real steps -- no per-step mask.
        @pl.when(c != n_chunks - 1)
        def _():
            h = lax.fori_loop(0, chunk, step, h_scratch[...], unroll=unroll)
            h_scratch[...] = h

        @pl.when(c == n_chunks - 1)
        def _():
            h = lax.fori_loop(0, tail, step, h_scratch[...], unroll=unroll)
            h_scratch[...] = h
            h_out_ref[...] = h


def rnn_forward(text, emb_table, w_ih, w_hh, b_ih, b_hh, w_fc, b_fc, *,
                chunk=None):
    """Forward pass matching the PyTorch RNN module.

    text: (S, B) int32 token ids (seq-major, PyTorch nn.RNN default)
    emb_table: (V, E)
    w_ih: (H, E), w_hh: (H, H), b_ih/b_hh: (H,)   (PyTorch nn.RNN layout)
    w_fc: (O, H), b_fc: (O,)                       (PyTorch nn.Linear layout)
    returns: (B, O)
    """
    S, B = text.shape
    H = w_ih.shape[0]
    V = emb_table.shape[0]

    # --- Hoisted input projection (done once, outside the recurrence) ---
    bias = (b_ih + b_hh).astype(jnp.float32)
    if S * B >= V:
        # Few distinct rows: pre-project the whole table, then gather.
        proj_table = emb_table.astype(jnp.float32) @ w_ih.T.astype(jnp.float32) + bias
        xproj = jnp.take(proj_table, text, axis=0)                    # (S, B, H)
    else:
        # Large vocab / short sequence: gather embeddings, then one matmul.
        emb = jnp.take(emb_table, text, axis=0).astype(jnp.float32)   # (S, B, E)
        xproj = emb @ w_ih.T.astype(jnp.float32) + bias               # (S, B, H)
    xproj = xproj.astype(jnp.float32)
    # TODO(synk): at large S*B*H, fuse the token gather into the kernel via
    # PrefetchScalarGridSpec(num_scalar_prefetch=1) + a resident (V, H)
    # proj_table to skip the (S, B, H) HBM round-trip.

    whh_t = w_hh.T.astype(jnp.bfloat16)  # (H, H), resident bf16 weight

    # --- Batch tiling ("parallel" axis; gives v7x its second TensorCore) ---
    b_pad = ((B + 7) // 8) * 8
    tb = b_pad
    if b_pad >= 256 and b_pad % 16 == 0:
        tb = b_pad // 2  # split only when each tile still feeds the MXU well
    if b_pad != B:
        xproj = jnp.pad(xproj, ((0, 0), (0, b_pad - B), (0, 0)))

    # --- Time chunking sized from a VMEM budget (safe on v5e/v6e/v7x) ---
    xproj_budget = 8 * 1024 * 1024  # per-buffer budget for the pipelined block
    if chunk is None:
        chunk = max(1, min(S, xproj_budget // (tb * H * 4)))
        chunk = min(chunk, 1024)
    s_pad = ((S + chunk - 1) // chunk) * chunk
    if s_pad != S:
        xproj = jnp.pad(xproj, ((0, s_pad - S), (0, 0), (0, 0)))
    unroll = True if chunk <= 16 else 8

    # Explicit scoped-VMEM limit with headroom (v7x has only 64 MiB per TC).
    vmem_needed = (2 * chunk * tb * H * 4      # xproj double buffer
                   + 2 * H * H * 2             # W_hh^T (bf16)
                   + 2 * tb * H * 4            # output block
                   + tb * H * 4)               # hidden-state scratch
    vmem_limit = int(min(64 * 2**20, max(2 * vmem_needed, 16 * 2**20)))

    h_final = pl.pallas_call(
        functools.partial(rnn_chunk_kernel, seq_len=S, chunk=chunk,
                          unroll=unroll),
        out_shape=jax.ShapeDtypeStruct((b_pad, H), jnp.float32),
        grid_spec=pltpu.PrefetchScalarGridSpec(
            num_scalar_prefetch=0,
            grid=(b_pad // tb, s_pad // chunk),
            in_specs=[
                pl.BlockSpec((chunk, tb, H), lambda bt, c: (c, bt, 0)),  # xproj chunk
                pl.BlockSpec((H, H), lambda bt, c: (0, 0)),              # W_hh^T resident
            ],
            out_specs=pl.BlockSpec((tb, H), lambda bt, c: (bt, 0)),      # final hidden
            scratch_shapes=[pltpu.VMEM((tb, H), jnp.float32)],           # hidden carry
        ),
        compiler_params=pltpu.CompilerParams(
            dimension_semantics=("parallel", "arbitrary"),
            vmem_limit_bytes=vmem_limit,
        ),
    )(xproj, whh_t)

    h_final = h_final[:B]
    # Final fc (O=4) in the wrapper: avoids a lane-sparse masked store in-kernel.
    return h_final @ w_fc.T + b_fc[None, :]


def rnn_reference(text, emb_table, w_ih, w_hh, b_ih, b_hh, w_fc, b_fc):
    """Pure-JAX f32 reference matching PyTorch nn.RNN (tanh) semantics."""
    embedded = jnp.take(emb_table, text, axis=0)  # (S, B, E)
    B = text.shape[1]
    H = w_ih.shape[0]
    h = jnp.zeros((B, H), jnp.float32)
    for t in range(text.shape[0]):
        h = jnp.tanh(embedded[t] @ w_ih.T + b_ih + h @ w_hh.T + b_hh)
    return h @ w_fc.T + b_fc


if __name__ == "__main__":
    # Small shapes consistent with the module's forward.
    SEQ, BATCH = 8, 8
    VOCAB, EMB, HID, OUT = 50, 128, 128, 4

    key = jax.random.PRNGKey(0)
    k_txt, k_emb, k_wih, k_whh, k_bih, k_bhh, k_wfc, k_bfc = jax.random.split(key, 8)

    text = jax.random.randint(k_txt, (SEQ, BATCH), 0, VOCAB, dtype=jnp.int32)

    # Deterministic parameter init (PyTorch-style uniform(-1/sqrt(H), 1/sqrt(H))).
    emb_table = jax.random.normal(k_emb, (VOCAB, EMB), jnp.float32)
    s = 1.0 / np.sqrt(HID)
    w_ih = jax.random.uniform(k_wih, (HID, EMB), jnp.float32, -s, s)
    w_hh = jax.random.uniform(k_whh, (HID, HID), jnp.float32, -s, s)
    b_ih = jax.random.uniform(k_bih, (HID,), jnp.float32, -s, s)
    b_hh = jax.random.uniform(k_bhh, (HID,), jnp.float32, -s, s)
    w_fc = jax.random.uniform(k_wfc, (OUT, HID), jnp.float32, -s, s)
    b_fc = jax.random.uniform(k_bfc, (OUT,), jnp.float32, -s, s)

    ref = rnn_reference(text, emb_table, w_ih, w_hh, b_ih, b_hh, w_fc, b_fc)

    # Default chunking (single chunk at this S).
    out = rnn_forward(text, emb_table, w_ih, w_hh, b_ih, b_hh, w_fc, b_fc)
    out = jax.block_until_ready(out)
    # bf16 weights on the recurrence -> loosened tolerance vs f32 reference.
    np.testing.assert_allclose(np.asarray(out), np.asarray(ref), rtol=2e-2, atol=2e-2)

    # Also exercise the multi-chunk + padded-tail path (chunk=3 -> S_pad=9).
    out2 = rnn_forward(text, emb_table, w_ih, w_hh, b_ih, b_hh, w_fc, b_fc, chunk=3)
    out2 = jax.block_until_ready(out2)
    np.testing.assert_allclose(np.asarray(out2), np.asarray(ref), rtol=2e-2, atol=2e-2)

    print("KERNEL_OK")
</pallas_src>

<mosaic_0001>
module attributes {stable_mosaic.version = 11 : i64} {
  func.func @rnn_chunk_kernel(%arg0: i32, %arg1: i32, %arg2: memref<8x8x128xf32, #tpu.memory_space<vmem>>, %arg3: memref<128x128xbf16, #tpu.memory_space<vmem>>, %arg4: memref<8x128xf32, #tpu.memory_space<vmem>>, %arg5: memref<8x128xf32, #tpu.memory_space<vmem>>) attributes {dimension_semantics = [#tpu.dimension_semantics<parallel>, #tpu.dimension_semantics<arbitrary>], iteration_bounds = array<i64: 1, 1>, scalar_prefetch = 0 : i64, scratch_operands = 1 : i64, tpu.core_type = #tpu.core_type<tc>, window_params = [{transform_indices = @transform_0, window_bounds = array<i64: 8, 8, 128>}, {pipeline_mode = #tpu.pipeline_mode<synchronous>, transform_indices = @transform_1, window_bounds = array<i64: 128, 128>}, {transform_indices = @transform_2, window_bounds = array<i64: 8, 128>}]} {
    %c0_i32 = arith.constant 0 : i32
    %0 = arith.cmpi eq, %arg1, %c0_i32 : i32
    %1 = arith.extui %0 : i1 to i32
    %c0_i32_0 = arith.constant 0 : i32
    %2 = arith.cmpi ne, %1, %c0_i32_0 : i32
    scf.if %2 {
      %cst_32 = arith.constant 0.000000e+00 : f32
      %65 = vector.broadcast %cst_32 : f32 to vector<8x128xf32>
      %c0_33 = arith.constant 0 : index
      %c0_34 = arith.constant 0 : index
      %66 = vector.load %arg5[%c0_33, %c0_34] : memref<8x128xf32, #tpu.memory_space<vmem>>, vector<8x128xf32>
      tpu.vector_store %arg5[%c0_33, %c0_34], %65 {strides = array<i32>} : memref<8x128xf32, #tpu.memory_space<vmem>>, vector<8x128xf32>,
    } else {
    }
    %c0 = arith.constant 0 : index
    %c0_1 = arith.constant 0 : index
    %3 = vector.load %arg3[%c0, %c0_1] : memref<128x128xbf16, #tpu.memory_space<vmem>>, vector<128x128xbf16>
    %c0_2 = arith.constant 0 : index
    %c0_3 = arith.constant 0 : index
    %4 = vector.load %arg5[%c0_2, %c0_3] : memref<8x128xf32, #tpu.memory_space<vmem>>, vector<8x128xf32>
    %c0_i32_4 = arith.constant 0 : i32
    %5 = arith.index_cast %c0_i32_4 : i32 to index
    %c0_5 = arith.constant 0 : index
    %c0_6 = arith.constant 0 : index
    %6 = vector.load %arg2[%5, %c0_5, %c0_6] : memref<8x8x128xf32, #tpu.memory_space<vmem>>, vector<1x8x128xf32>
    %7 = vector.shape_cast %6 : vector<1x8x128xf32> to vector<8x128xf32>
    %8 = arith.truncf %4 : vector<8x128xf32> to vector<8x128xbf16>
    %cst = arith.constant dense<0.000000e+00> : vector<8x128xf32>
    %9 = tpu.matmul %8, %3, %cst {dimension_numbers = #tpu.dot_dimension_numbers<[1], [0], [0], [1], [0, 0, 1, 1], [], []>} : vector<8x128xbf16>, vector<128x128xbf16>, vector<8x128xf32> -> vector<8x128xf32>
    %10 = arith.addf %7, %9 : vector<8x128xf32>
    %11 = math.tanh %10 : vector<8x128xf32>
    %c1_i32 = arith.constant 1 : i32
    %12 = arith.index_cast %c1_i32 : i32 to index
    %c0_7 = arith.constant 0 : index
    %c0_8 = arith.constant 0 : index
    %13 = vector.load %arg2[%12, %c0_7, %c0_8] : memref<8x8x128xf32, #tpu.memory_space<vmem>>, vector<1x8x128xf32>
    %14 = vector.shape_cast %13 : vector<1x8x128xf32> to vector<8x128xf32>
    %15 = arith.truncf %11 : vector<8x128xf32> to vector<8x128xbf16>
    %cst_9 = arith.constant dense<0.000000e+00> : vector<8x128xf32>
    %16 = tpu.matmul %15, %3, %cst_9 {dimension_numbers = #tpu.dot_dimension_numbers<[1], [0], [0], [1], [0, 0, 1, 1], [], []>} : vector<8x128xbf16>, vector<128x128xbf16>, vector<8x128xf32> -> vector<8x128xf32>
    %17 = arith.addf %14, %16 : vector<8x128xf32>
    %18 = math.tanh %17 : vector<8x128xf32>
    %c2_i32 = arith.constant 2 : i32
    %19 = arith.index_cast %c2_i32 : i32 to index
    %c0_10 = arith.constant 0 : index
    %c0_11 = arith.constant 0 : index
    %20 = vector.load %arg2[%19, %c0_10, %c0_11] : memref<8x8x128xf32, #tpu.memory_space<vmem>>, vector<1x8x128xf32>
    %21 = vector.shape_cast %20 : vector<1x8x128xf32> to vector<8x128xf32>
    %22 = arith.truncf %18 : vector<8x128xf32> to vector<8x128xbf16>
    %cst_12 = arith.constant dense<0.000000e+00> : vector<8x128xf32>
    %23 = tpu.matmul %22, %3, %cst_12 {dimension_numbers = #tpu.dot_dimension_numbers<[1], [0], [0], [1], [0, 0, 1, 1], [], []>} : vector<8x128xbf16>, vector<128x128xbf16>, vector<8x128xf32> -> vector<8x128xf32>
    %24 = arith.addf %21, %23 : vector<8x128xf32>
    %25 = math.tanh %24 : vector<8x128xf32>
    %c3_i32 = arith.constant 3 : i32
    %26 = arith.index_cast %c3_i32 : i32 to index
    %c0_13 = arith.constant 0 : index
    %c0_14 = arith.constant 0 : index
    %27 = vector.load %arg2[%26, %c0_13, %c0_14] : memref<8x8x128xf32, #tpu.memory_space<vmem>>, vector<1x8x128xf32>
    %28 = vector.shape_cast %27 : vector<1x8x128xf32> to vector<8x128xf32>
    %29 = arith.truncf %25 : vector<8x128xf32> to vector<8x128xbf16>
    %cst_15 = arith.constant dense<0.000000e+00> : vector<8x128xf32>
    %30 = tpu.matmul %29, %3, %cst_15 {dimension_numbers = #tpu.dot_dimension_numbers<[1], [0], [0], [1], [0, 0, 1, 1], [], []>} : vector<8x128xbf16>, vector<128x128xbf16>, vector<8x128xf32> -> vector<8x128xf32>
    %31 = arith.addf %28, %30 : vector<8x128xf32>
    %32 = math.tanh %31 : vector<8x128xf32>
    %c4_i32 = arith.constant 4 : i32
    %33 = arith.index_cast %c4_i32 : i32 to index
    %c0_16 = arith.constant 0 : index
    %c0_17 = arith.constant 0 : index
    %34 = vector.load %arg2[%33, %c0_16, %c0_17] : memref<8x8x128xf32, #tpu.memory_space<vmem>>, vector<1x8x128xf32>
    %35 = vector.shape_cast %34 : vector<1x8x128xf32> to vector<8x128xf32>
    %36 = arith.truncf %32 : vector<8x128xf32> to vector<8x128xbf16>
    %cst_18 = arith.constant dense<0.000000e+00> : vector<8x128xf32>
    %37 = tpu.matmul %36, %3, %cst_18 {dimension_numbers = #tpu.dot_dimension_numbers<[1], [0], [0], [1], [0, 0, 1, 1], [], []>} : vector<8x128xbf16>, vector<128x128xbf16>, vector<8x128xf32> -> vector<8x128xf32>
    %38 = arith.addf %35, %37 : vector<8x128xf32>
    %39 = math.tanh %38 : vector<8x128xf32>
    %c5_i32 = arith.constant 5 : i32
    %40 = arith.index_cast %c5_i32 : i32 to index
    %c0_19 = arith.constant 0 : index
    %c0_20 = arith.constant 0 : index
    %41 = vector.load %arg2[%40, %c0_19, %c0_20] : memref<8x8x128xf32, #tpu.memory_space<vmem>>, vector<1x8x128xf32>
    %42 = vector.shape_cast %41 : vector<1x8x128xf32> to vector<8x128xf32>
    %43 = arith.truncf %39 : vector<8x128xf32> to vector<8x128xbf16>
    %cst_21 = arith.constant dense<0.000000e+00> : vector<8x128xf32>
    %44 = tpu.matmul %43, %3, %cst_21 {dimension_numbers = #tpu.dot_dimension_numbers<[1], [0], [0], [1], [0, 0, 1, 1], [], []>} : vector<8x128xbf16>, vector<128x128xbf16>, vector<8x128xf32> -> vector<8x128xf32>
    %45 = arith.addf %42, %44 : vector<8x128xf32>
    %46 = math.tanh %45 : vector<8x128xf32>
    %c6_i32 = arith.constant 6 : i32
    %47 = arith.index_cast %c6_i32 : i32 to index
    %c0_22 = arith.constant 0 : index
    %c0_23 = arith.constant 0 : index
    %48 = vector.load %arg2[%47, %c0_22, %c0_23] : memref<8x8x128xf32, #tpu.memory_space<vmem>>, vector<1x8x128xf32>
    %49 = vector.shape_cast %48 : vector<1x8x128xf32> to vector<8x128xf32>
    %50 = arith.truncf %46 : vector<8x128xf32> to vector<8x128xbf16>
    %cst_24 = arith.constant dense<0.000000e+00> : vector<8x128xf32>
    %51 = tpu.matmul %50, %3, %cst_24 {dimension_numbers = #tpu.dot_dimension_numbers<[1], [0], [0], [1], [0, 0, 1, 1], [], []>} : vector<8x128xbf16>, vector<128x128xbf16>, vector<8x128xf32> -> vector<8x128xf32>
    %52 = arith.addf %49, %51 : vector<8x128xf32>
    %53 = math.tanh %52 : vector<8x128xf32>
    %c7_i32 = arith.constant 7 : i32
    %54 = arith.index_cast %c7_i32 : i32 to index
    %c0_25 = arith.constant 0 : index
    %c0_26 = arith.constant 0 : index
    %55 = vector.load %arg2[%54, %c0_25, %c0_26] : memref<8x8x128xf32, #tpu.memory_space<vmem>>, vector<1x8x128xf32>
    %56 = vector.shape_cast %55 : vector<1x8x128xf32> to vector<8x128xf32>
    %57 = arith.truncf %53 : vector<8x128xf32> to vector<8x128xbf16>
    %cst_27 = arith.constant dense<0.000000e+00> : vector<8x128xf32>
    %58 = tpu.matmul %57, %3, %cst_27 {dimension_numbers = #tpu.dot_dimension_numbers<[1], [0], [0], [1], [0, 0, 1, 1], [], []>} : vector<8x128xbf16>, vector<128x128xbf16>, vector<8x128xf32> -> vector<8x128xf32>
    %59 = arith.addf %56, %58 : vector<8x128xf32>
    %60 = math.tanh %59 : vector<8x128xf32>
    %c8_i32 = arith.constant 8 : i32
    %c0_28 = arith.constant 0 : index
    %c0_29 = arith.constant 0 : index
    %61 = vector.load %arg5[%c0_28, %c0_29] : memref<8x128xf32, #tpu.memory_space<vmem>>, vector<8x128xf32>
    tpu.vector_store %arg5[%c0_28, %c0_29], %60 {strides = array<i32>} : memref<8x128xf32, #tpu.memory_space<vmem>>, vector<8x128xf32>,
    %c0_i32_30 = arith.constant 0 : i32
    %62 = arith.cmpi eq, %arg1, %c0_i32_30 : i32
    %63 = arith.extui %62 : i1 to i32
    %c0_i32_31 = arith.constant 0 : i32
    %64 = arith.cmpi ne, %63, %c0_i32_31 : i32
    scf.if %64 {
      %c0_32 = arith.constant 0 : index
      %c0_33 = arith.constant 0 : index
      %65 = vector.load %arg4[%c0_32, %c0_33] : memref<8x128xf32, #tpu.memory_space<vmem>>, vector<8x128xf32>
      tpu.vector_store %arg4[%c0_32, %c0_33], %60 {strides = array<i32>} : memref<8x128xf32, #tpu.memory_space<vmem>>, vector<8x128xf32>,
    } else {
    }
    return
  }
  func.func @transform_0(%arg0: i32, %arg1: i32) -> (i32, i32, i32) {
    %c0_i32 = arith.constant 0 : i32
    %c0_i32_0 = arith.constant 0 : i32
    return %arg1, %arg0, %c0_i32 : i32, i32, i32
  }
  func.func @transform_1(%arg0: i32, %arg1: i32) -> (i32, i32) {
    %c0_i32 = arith.constant 0 : i32
    %c0_i32_0 = arith.constant 0 : i32
    %c0_i32_1 = arith.constant 0 : i32
    return %c0_i32, %c0_i32_0 : i32, i32
  }
  func.func @transform_2(%arg0: i32, %arg1: i32) -> (i32, i32) {
    %c0_i32 = arith.constant 0 : i32
    %c0_i32_0 = arith.constant 0 : i32
    return %arg0, %c0_i32 : i32, i32
  }
}

</mosaic_0001>

<bundles_post_ra>
// kernel: tpu_custom_call.1
= control target key start
LH: loop header
LB: loop body
LE: loop exit
PB: predicated region body
PF: predicated region fallthrough
CT: control target
= control target key end

     0   :  { %7 = vsyncpa [#allocation4], 0  ;;  %s1058_s0 = inlined_call_operand.hbm [shape: f32[8,8,128], index: 0, kind: input, shape index: {}]   ;;  %s1059_s1 = inlined_call_operand.hbm [shape: bf16[128,128], index: 1, kind: input, shape index: {}]   ;;  %s1060_s2 = inlined_call_operand.hbm [shape: f32[8,128], index: 2, kind: output, shape index: {}]  }
   0x1   :  { %8 = vsyncpa [#allocation7], 0 }
   0x2   :  { %9 = vsyncpa [#allocation5], 0  ;;  %s837_s9 = smov [#allocation3]   ;;  %s765_s13 = scalar_lea.hbm %s1058_s0, 1024 }
   0x3   :  { %s15_s10 = sshll.u32 %s837_s9, 4  ;;  %p766_p0 = scmp.ne.s32.totalorder %s1058_s0, %s765_s13  ;;  %s16_s10 = int_to_ptr.vmem [resolvable:$true] %s15_s10 }
   0x4   :  { %p769_p1 = scmp.lt.u32.totalorder %s765_s13, %s1058_s0 }
   0x6   :  { %p771_p2 = pnand %p769_p1, %p766_p0 }
   0x8   :  { %774 = shalt.err (!%p771_p2)
}
   0x9   :  { %s775_s18 = scalar_lea.vmem %s16_s10, 1024  ;;  %p780_p4 = scmp.lt.s32.totalorder %s16_s10, %s16_s10 }
   0xa   :  { %p776_p3 = scmp.ne.s32.totalorder %s16_s10, %s775_s18  ;;  %p781_p5 = scmp.lt.s32.totalorder %s775_s18, %s775_s18 }
   0xc   :  { %p782_p6 = por %p781_p5, %p780_p4 }
   0xe   :  { %p783_p7 = pnand %p782_p6, %p776_p3 }
  0x10   :  { %786 = shalt.err (!%p783_p7)
}
  0x11   :  { %s838_s19 = smov 128   ;;  %s839_s20 = smov 8  }
  0x12   :  { %21 = dma.hbm_to_vmem [thread:$0]  %s1058_s0, 1024, %s16_s10, [#allocation4], %s838_s19, %s838_s19, %s839_s20  }
  0x13   :  { %s840_s23 = smov [#allocation6]   ;;  %s787_s27 = scalar_lea.hbm %s1059_s1, 1024 }
  0x14   :  { %s27_s24 = sshll.u32 %s840_s23, 4  ;;  %p788_p8 = scmp.ne.s32.totalorder %s1059_s1, %s787_s27  ;;  %s28_s24 = int_to_ptr.vmem [resolvable:$true] %s27_s24 }
  0x15   :  { %p791_p9 = scmp.lt.u32.totalorder %s787_s27, %s1059_s1 }
  0x17   :  { %p793_p10 = pnand %p791_p9, %p788_p8 }
  0x19   :  { %796 = shalt.err (!%p793_p10)
}
  0x1a   :  { %s797_s4 = scalar_lea.vmem %s28_s24, 1024  ;;  %p802_p12 = scmp.lt.s32.totalorder %s28_s24, %s28_s24 }
  0x1b   :  { %p798_p11 = scmp.ne.s32.totalorder %s28_s24, %s797_s4  ;;  %p803_p13 = scmp.lt.s32.totalorder %s797_s4, %s797_s4 }
  0x1d   :  { %p804_p0 = por %p803_p13, %p802_p12 }
  0x1f   :  { %p805_p1 = pnand %p804_p0, %p798_p11 }
  0x21   :  { %808 = shalt.err (!%p805_p1)
}
  0x22   :  { %s841_s0 = smov 64   ;;  %s842_s5 = smov 4  }
  0x23   :  { %33 = dma.hbm_to_vmem [thread:$0]  %s1059_s1, 1024, %s28_s24, [#allocation7], %s841_s0, %s841_s0, %s842_s5  }
  0x24   :  { %831 = dma.done.wait [#allocation4], 1024  }
  0x25   :  { %832 = vsyncadd [#allocation4], 4294966272 }
  0x26   :  { %833 = dma.done.wait [#allocation7], 1024  }
  0x27   :  { %834 = vsyncadd [#allocation7], 4294966272  ;;  %v843_v0 = vmov 0.0   ;;  %vm844_vm0 = vmmov 0   ;;  %v892_v1 = vld [vmem:[#allocation6] sm:$0xff]   ;;  %v895_v2 = vld [vmem:[#allocation6 + $0x8] sm:$0xff]  }
  0x28   :  { %571 = vmatprep.subr.bf16.mxu0 %v843_v0  ;;  %587 = vmatprep.mubr.msk.bf16.mxu0 %vm844_vm0, %v843_v0  ;;  %v901_v3 = vld [vmem:[#allocation6 + $0x10] sm:$0xff]   ;;  %v907_v4 = vld [vmem:[#allocation6 + $0x18] sm:$0xff]   ;;  %v913_v5 = vld [vmem:[#allocation6 + $0x20] sm:$0xff]   ;;  %v845_v9 = vmov 0.0|0.0   ;;  %s846_s1 = smov [#allocation8]  }
  0x29   :  { %591 = vmatprep.subr.bf16.mxu1 %v843_v0  ;;  %607 = vmatprep.mubr.msk.bf16.mxu1 %vm844_vm0, %v843_v0  ;;  %v919_v6 = vld [vmem:[#allocation6 + $0x28] sm:$0xff]   ;;  %v925_v7 = vld [vmem:[#allocation6 + $0x30] sm:$0xff]   ;;  %v931_v8 = vld [vmem:[#allocation6 + $0x38] sm:$0xff]   ;;  %s481_s8 = sshll.u32 %s846_s1, 4  ;;  %s482_s8 = int_to_ptr.vmem [resolvable:$true] %s481_s8 }
  0x2a   :  { %572 = vmatpush3.bf16.msra.mxu0 %v892_v1  ;;  %592 = vmatpush3.bf16.msra.mxu1 %v892_v1  ;;  %v63_v10 = vld [vmem:[#allocation3] sm:$0xff]  ;;  %v156_v18 = vld [vmem:[#allocation3 + $0x8] sm:$0xff]  ;;  %v201_v26 = vld [vmem:[#allocation3 + $0x10] sm:$0xff]  ;;  %s809_s9 = scalar_lea.vmem %s482_s8, 128  ;;  %p814_p3 = scmp.lt.s32.totalorder %s482_s8, %s482_s8 }
  0x2b   :  { %573 = vmatprep.subr.bf16.mxu0 %v843_v0  ;;  %593 = vmatprep.subr.bf16.mxu1 %v843_v0  ;;  %v246_v34 = vld [vmem:[#allocation3 + $0x18] sm:$0xff]  ;;  %v291_v42 = vld [vmem:[#allocation3 + $0x20] sm:$0xff]  ;;  %v336_v50 = vld [vmem:[#allocation3 + $0x28] sm:$0xff]  ;;  %p810_p2 = scmp.ne.s32.totalorder %s482_s8, %s809_s9  ;;  %p815_p4 = scmp.lt.s32.totalorder %s809_s9, %s809_s9 }
  0x2c   :  { %v381_v58 = vld [vmem:[#allocation3 + $0x30] sm:$0xff] }
  0x2d   :  { %p816_p5 = por %p815_p4, %p814_p3 }
  0x2e   :  { %574 = vmatpush3.bf16.msra.mxu0 %v895_v2  ;;  %594 = vmatpush3.bf16.msra.mxu1 %v895_v2 }
  0x2f   :  { %575 = vmatprep.subr.bf16.mxu0 %v843_v0  ;;  %595 = vmatprep.subr.bf16.mxu1 %v843_v0  ;;  %p817_p6 = pnand %p816_p5, %p810_p2 }
  0x32   :  { %576 = vmatpush3.bf16.msra.mxu0 %v901_v3  ;;  %596 = vmatpush3.bf16.msra.mxu1 %v901_v3 }
  0x33   :  { %577 = vmatprep.subr.bf16.mxu0 %v843_v0  ;;  %597 = vmatprep.subr.bf16.mxu1 %v843_v0 }
  0x36   :  { %578 = vmatpush3.bf16.msra.mxu0 %v907_v4  ;;  %598 = vmatpush3.bf16.msra.mxu1 %v907_v4 }
  0x37   :  { %579 = vmatprep.subr.bf16.mxu0 %v843_v0  ;;  %599 = vmatprep.subr.bf16.mxu1 %v843_v0 }
  0x3a   :  { %580 = vmatpush3.bf16.msra.mxu0 %v913_v5  ;;  %600 = vmatpush3.bf16.msra.mxu1 %v913_v5 }
  0x3b   :  { %581 = vmatprep.subr.bf16.mxu0 %v843_v0  ;;  %601 = vmatprep.subr.bf16.mxu1 %v843_v0 }
  0x3e   :  { %582 = vmatpush3.bf16.msra.mxu0 %v919_v6  ;;  %602 = vmatpush3.bf16.msra.mxu1 %v919_v6 }
  0x3f   :  { %583 = vmatprep.subr.bf16.mxu0 %v843_v0  ;;  %603 = vmatprep.subr.bf16.mxu1 %v843_v0 }
  0x42   :  { %584 = vmatpush3.bf16.msra.mxu0 %v925_v7  ;;  %604 = vmatpush3.bf16.msra.mxu1 %v925_v7 }
  0x43   :  { %585 = vmatprep.subr.bf16.mxu0 %v843_v0  ;;  %605 = vmatprep.subr.bf16.mxu1 %v843_v0 }
  0x46   :  { %586 = vmatpush3.bf16.msra.mxu0 %v931_v8  ;;  %606 = vmatpush3.bf16.msra.mxu1 %v931_v8 }
  0x47   :  { %611 = vmatprep.subr.bf16.mxu0 %v843_v0  ;;  %631 = vmatprep.subr.bf16.mxu1 %v843_v0 }
  0x49   :  { %588 = vmatmul.mubr.bf16.vlgmr.msra.gmra.mrb[0].mxu0 %v845_v9 }
  0x4a   :  { %612 = vmatpush3.bf16.msra.mxu0 %v892_v1  ;;  %627 = vmatprep.mubr.msk.bf16.mxu0 %vm844_vm0, %v843_v0 }
  0x4b   :  { %613 = vmatprep.subr.bf16.mxu0 %v843_v0 }
  0x4e   :  { %614 = vmatpush3.bf16.msra.mxu0 %v895_v2 }
  0x4f   :  { %615 = vmatprep.subr.bf16.mxu0 %v843_v0 }
  0x52   :  { %616 = vmatpush3.bf16.msra.mxu0 %v901_v3 }
  0x53   :  { %617 = vmatprep.subr.bf16.mxu0 %v843_v0 }
  0x56   :  { %618 = vmatpush3.bf16.msra.mxu0 %v907_v4 }
  0x57   :  { %619 = vmatprep.subr.bf16.mxu0 %v843_v0 }
  0x5a   :  { %620 = vmatpush3.bf16.msra.mxu0 %v913_v5 }
  0x5b   :  { %621 = vmatprep.subr.bf16.mxu0 %v843_v0 }
  0x5e   :  { %622 = vmatpush3.bf16.msra.mxu0 %v919_v6 }
  0x5f   :  { %623 = vmatprep.subr.bf16.mxu0 %v843_v0 }
  0x62   :  { %624 = vmatpush3.bf16.msra.mxu0 %v925_v7 }
  0x63   :  { %625 = vmatprep.subr.bf16.mxu0 %v843_v0 }
  0x66   :  { %626 = vmatpush3.bf16.msra.mxu0 %v931_v8 }
  0x67   :  { %651 = vmatprep.subr.bf16.mxu0 %v843_v0 }
 0x11c   :  { %v147_v11 = vpop.f32.mrb[0].mxu0 }
 0x11d   :  { %v153_v12 = vadd.f32 %v147_v11, %v63_v10  ;;  %v589_v13 = vpop.f32.mrb[1].mxu0 }
 0x11e   :  { %v150_v14 = vpop.f32.mrb[2].mxu0 }
 0x11f   :  { %749 = vtanh.f32 %v153_v12  ;;  %v590_v15 = vpop.f32.mrb[3].mxu0 }
 0x129   :  { %v750_v16 = vpop.eup %749 }
 0x12a   :  { %v157_v17 = vpack.c.bf16 %v750_v16, %v750_v16 }
 0x12c   :  { %608 = vmatmul.mubr.bf16.vlgmr.msra.gmra.mrb[0].mxu1 %v157_v17 }
 0x12d   :  { %632 = vmatpush3.bf16.msra.mxu1 %v892_v1  ;;  %647 = vmatprep.mubr.msk.bf16.mxu1 %vm844_vm0, %v843_v0 }
 0x12e   :  { %633 = vmatprep.subr.bf16.mxu1 %v843_v0 }
 0x131   :  { %634 = vmatpush3.bf16.msra.mxu1 %v895_v2 }
 0x132   :  { %635 = vmatprep.subr.bf16.mxu1 %v843_v0 }
 0x135   :  { %636 = vmatpush3.bf16.msra.mxu1 %v901_v3 }
 0x136   :  { %637 = vmatprep.subr.bf16.mxu1 %v843_v0 }
 0x139   :  { %638 = vmatpush3.bf16.msra.mxu1 %v907_v4 }
 0x13a   :  { %639 = vmatprep.subr.bf16.mxu1 %v843_v0 }
 0x13d   :  { %640 = vmatpush3.bf16.msra.mxu1 %v913_v5 }
 0x13e   :  { %641 = vmatprep.subr.bf16.mxu1 %v843_v0 }
 0x141   :  { %642 = vmatpush3.bf16.msra.mxu1 %v919_v6 }
 0x142   :  { %643 = vmatprep.subr.bf16.mxu1 %v843_v0 }
 0x145   :  { %644 = vmatpush3.bf16.msra.mxu1 %v925_v7 }
 0x146   :  { %645 = vmatprep.subr.bf16.mxu1 %v843_v0 }
 0x149   :  { %646 = vmatpush3.bf16.msra.mxu1 %v931_v8 }
 0x14a   :  { %671 = vmatprep.subr.bf16.mxu1 %v843_v0 }
 0x1ff   :  { %v192_v19 = vpop.f32.mrb[0].mxu1 }
 0x200   :  { %v198_v20 = vadd.f32 %v192_v19, %v156_v18  ;;  %v609_v21 = vpop.f32.mrb[1].mxu1 }
 0x201   :  { %v195_v22 = vpop.f32.mrb[2].mxu1 }
 0x202   :  { %751 = vtanh.f32 %v198_v20  ;;  %v610_v23 = vpop.f32.mrb[3].mxu1 }
 0x20c   :  { %v752_v24 = vpop.eup %751 }
 0x20d   :  { %v202_v25 = vpack.c.bf16 %v752_v24, %v752_v24 }
 0x20f   :  { %628 = vmatmul.mubr.bf16.vlgmr.msra.gmra.mrb[4].mxu0 %v202_v25 }
 0x210   :  { %652 = vmatpush3.bf16.msra.mxu0 %v892_v1  ;;  %667 = vmatprep.mubr.msk.bf16.mxu0 %vm844_vm0, %v843_v0 }
 0x211   :  { %653 = vmatprep.subr.bf16.mxu0 %v843_v0 }
 0x214   :  { %654 = vmatpush3.bf16.msra.mxu0 %v895_v2 }
 0x215   :  { %655 = vmatprep.subr.bf16.mxu0 %v843_v0 }
 0x218   :  { %656 = vmatpush3.bf16.msra.mxu0 %v901_v3 }
 0x219   :  { %657 = vmatprep.subr.bf16.mxu0 %v843_v0 }
 0x21c   :  { %658 = vmatpush3.bf16.msra.mxu0 %v907_v4 }
 0x21d   :  { %659 = vmatprep.subr.bf16.mxu0 %v843_v0 }
 0x220   :  { %660 = vmatpush3.bf16.msra.mxu0 %v913_v5 }
 0x221   :  { %661 = vmatprep.subr.bf16.mxu0 %v843_v0 }
 0x224   :  { %662 = vmatpush3.bf16.msra.mxu0 %v919_v6 }
 0x225   :  { %663 = vmatprep.subr.bf16.mxu0 %v843_v0 }
 0x228   :  { %664 = vmatpush3.bf16.msra.mxu0 %v925_v7 }
 0x229   :  { %665 = vmatprep.subr.bf16.mxu0 %v843_v0 }
 0x22c   :  { %666 = vmatpush3.bf16.msra.mxu0 %v931_v8 }
 0x22d   :  { %691 = vmatprep.subr.bf16.mxu0 %v843_v0 }
 0x2e2   :  { %v237_v27 = vpop.f32.mrb[4].mxu0 }
 0x2e3   :  { %v243_v28 = vadd.f32 %v237_v27, %v201_v26  ;;  %v629_v29 = vpop.f32.mrb[5].mxu0 }
 0x2e4   :  { %v240_v30 = vpop.f32.mrb[6].mxu0 }
 0x2e5   :  { %753 = vtanh.f32 %v243_v28  ;;  %v630_v31 = vpop.f32.mrb[7].mxu0 }
 0x2ef   :  { %v754_v32 = vpop.eup %753 }
 0x2f0   :  { %v247_v33 = vpack.c.bf16 %v754_v32, %v754_v32 }
 0x2f2   :  { %648 = vmatmul.mubr.bf16.vlgmr.msra.gmra.mrb[4].mxu1 %v247_v33 }
 0x2f3   :  { %672 = vmatpush3.bf16.msra.mxu1 %v892_v1  ;;  %687 = vmatprep.mubr.msk.bf16.mxu1 %vm844_vm0, %v843_v0 }
 0x2f4   :  { %673 = vmatprep.subr.bf16.mxu1 %v843_v0 }
 0x2f7   :  { %674 = vmatpush3.bf16.msra.mxu1 %v895_v2 }
 0x2f8   :  { %675 = vmatprep.subr.bf16.mxu1 %v843_v0 }
 0x2fb   :  { %676 = vmatpush3.bf16.msra.mxu1 %v901_v3 }
 0x2fc   :  { %677 = vmatprep.subr.bf16.mxu1 %v843_v0 }
 0x2ff   :  { %678 = vmatpush3.bf16.msra.mxu1 %v907_v4 }
 0x300   :  { %679 = vmatprep.subr.bf16.mxu1 %v843_v0 }
 0x303   :  { %680 = vmatpush3.bf16.msra.mxu1 %v913_v5 }
 0x304   :  { %681 = vmatprep.subr.bf16.mxu1 %v843_v0 }
 0x307   :  { %682 = vmatpush3.bf16.msra.mxu1 %v919_v6 }
 0x308   :  { %683 = vmatprep.subr.bf16.mxu1 %v843_v0 }
 0x30b   :  { %684 = vmatpush3.bf16.msra.mxu1 %v925_v7 }
 0x30c   :  { %685 = vmatprep.subr.bf16.mxu1 %v843_v0 }
 0x30f   :  { %686 = vmatpush3.bf16.msra.mxu1 %v931_v8 }
 0x310   :  { %711 = vmatprep.subr.bf16.mxu1 %v843_v0 }
 0x3c5   :  { %v282_v35 = vpop.f32.mrb[4].mxu1 }
 0x3c6   :  { %v288_v36 = vadd.f32 %v282_v35, %v246_v34  ;;  %v649_v37 = vpop.f32.mrb[5].mxu1 }
 0x3c7   :  { %v285_v38 = vpop.f32.mrb[6].mxu1 }
 0x3c8   :  { %755 = vtanh.f32 %v288_v36  ;;  %v650_v39 = vpop.f32.mrb[7].mxu1 }
 0x3d2   :  { %v756_v40 = vpop.eup %755 }
 0x3d3   :  { %v292_v41 = vpack.c.bf16 %v756_v40, %v756_v40 }
 0x3d5   :  { %668 = vmatmul.mubr.bf16.vlgmr.msra.gmra.mrb[8].mxu0 %v292_v41 }
 0x3d6   :  { %692 = vmatpush3.bf16.msra.mxu0 %v892_v1  ;;  %707 = vmatprep.mubr.msk.bf16.mxu0 %vm844_vm0, %v843_v0 }
 0x3d7   :  { %693 = vmatprep.subr.bf16.mxu0 %v843_v0 }
 0x3da   :  { %694 = vmatpush3.bf16.msra.mxu0 %v895_v2 }
 0x3db   :  { %695 = vmatprep.subr.bf16.mxu0 %v843_v0 }
 0x3de   :  { %696 = vmatpush3.bf16.msra.mxu0 %v901_v3 }
 0x3df   :  { %697 = vmatprep.subr.bf16.mxu0 %v843_v0 }
 0x3e2   :  { %698 = vmatpush3.bf16.msra.mxu0 %v907_v4 }
 0x3e3   :  { %699 = vmatprep.subr.bf16.mxu0 %v843_v0 }
 0x3e6   :  { %700 = vmatpush3.bf16.msra.mxu0 %v913_v5 }
 0x3e7   :  { %701 = vmatprep.subr.bf16.mxu0 %v843_v0 }
 0x3ea   :  { %702 = vmatpush3.bf16.msra.mxu0 %v919_v6 }
 0x3eb   :  { %703 = vmatprep.subr.bf16.mxu0 %v843_v0 }
 0x3ee   :  { %704 = vmatpush3.bf16.msra.mxu0 %v925_v7 }
 0x3ef   :  { %705 = vmatprep.subr.bf16.mxu0 %v843_v0 }
 0x3f2   :  { %706 = vmatpush3.bf16.msra.mxu0 %v931_v8 }
 0x4a8   :  { %v327_v43 = vpop.f32.mrb[8].mxu0 }
 0x4a9   :  { %v333_v44 = vadd.f32 %v327_v43, %v291_v42  ;;  %v669_v45 = vpop.f32.mrb[9].mxu0 }
 0x4aa   :  { %v330_v46 = vpop.f32.mrb[10].mxu0 }
 0x4ab   :  { %757 = vtanh.f32 %v333_v44  ;;  %v670_v47 = vpop.f32.mrb[11].mxu0 }
 0x4b5   :  { %v758_v48 = vpop.eup %757 }
 0x4b6   :  { %v337_v49 = vpack.c.bf16 %v758_v48, %v758_v48 }
 0x4b8   :  { %688 = vmatmul.mubr.bf16.vlgmr.msra.gmra.mrb[8].mxu1 %v337_v49 }
 0x4b9   :  { %712 = vmatpush3.bf16.msra.mxu1 %v892_v1  ;;  %727 = vmatprep.mubr.msk.bf16.mxu1 %vm844_vm0, %v843_v0 }
 0x4ba   :  { %713 = vmatprep.subr.bf16.mxu1 %v843_v0 }
 0x4bd   :  { %714 = vmatpush3.bf16.msra.mxu1 %v895_v2  ;;  %v426_v2 = vld [vmem:[#allocation3 + $0x38] sm:$0xff] }
 0x4be   :  { %715 = vmatprep.subr.bf16.mxu1 %v843_v0 }
 0x4c1   :  { %716 = vmatpush3.bf16.msra.mxu1 %v901_v3 }
 0x4c2   :  { %717 = vmatprep.subr.bf16.mxu1 %v843_v0 }
 0x4c5   :  { %718 = vmatpush3.bf16.msra.mxu1 %v907_v4 }
 0x4c6   :  { %719 = vmatprep.subr.bf16.mxu1 %v843_v0 }
 0x4c9   :  { %720 = vmatpush3.bf16.msra.mxu1 %v913_v5 }
 0x4ca   :  { %721 = vmatprep.subr.bf16.mxu1 %v843_v0 }
 0x4cd   :  { %722 = vmatpush3.bf16.msra.mxu1 %v919_v6 }
 0x4ce   :  { %723 = vmatprep.subr.bf16.mxu1 %v843_v0 }
 0x4d1   :  { %724 = vmatpush3.bf16.msra.mxu1 %v925_v7 }
 0x4d2   :  { %725 = vmatprep.subr.bf16.mxu1 %v843_v0 }
 0x4d5   :  { %726 = vmatpush3.bf16.msra.mxu1 %v931_v8 }
 0x58b   :  { %v372_v51 = vpop.f32.mrb[8].mxu1 }
 0x58c   :  { %v378_v52 = vadd.f32 %v372_v51, %v336_v50  ;;  %v689_v53 = vpop.f32.mrb[9].mxu1 }
 0x58d   :  { %v375_v54 = vpop.f32.mrb[10].mxu1 }
 0x58e   :  { %759 = vtanh.f32 %v378_v52  ;;  %v690_v55 = vpop.f32.mrb[11].mxu1 }
 0x598   :  { %v760_v56 = vpop.eup %759 }
 0x599   :  { %v382_v57 = vpack.c.bf16 %v760_v56, %v760_v56 }
 0x59b   :  { %708 = vmatmul.mubr.bf16.vlgmr.msra.gmra.mrb[12].mxu0 %v382_v57 }
 0x66e   :  { %v417_v59 = vpop.f32.mrb[12].mxu0 }
 0x66f   :  { %v423_v60 = vadd.f32 %v417_v59, %v381_v58  ;;  %v709_v61 = vpop.f32.mrb[13].mxu0 }
 0x670   :  { %v420_v62 = vpop.f32.mrb[14].mxu0 }
 0x671   :  { %761 = vtanh.f32 %v423_v60  ;;  %v710_v63 = vpop.f32.mrb[15].mxu0 }
 0x67b   :  { %v762_v0 = vpop.eup %761 }
 0x67c   :  { %v427_v1 = vpack.c.bf16 %v762_v0, %v762_v0 }
 0x67e   :  { %728 = vmatmul.mubr.bf16.vlgmr.msra.gmra.mrb[12].mxu1 %v427_v1 }
 0x751   :  { %v462_v3 = vpop.f32.mrb[12].mxu1 }
 0x752   :  { %v468_v4 = vadd.f32 %v462_v3, %v426_v2  ;;  %v729_v5 = vpop.f32.mrb[13].mxu1 }
 0x753   :  { %v465_v6 = vpop.f32.mrb[14].mxu1 }
 0x754   :  { %763 = vtanh.f32 %v468_v4  ;;  %v730_v7 = vpop.f32.mrb[15].mxu1 }
 0x75e   :  { %v764_v8 = vpop.eup %763 }
 0x75f   :  { %474 = vst [vmem:[#allocation8] sm:$0xff] %v764_v8 }
 0x760   :  { %820 = shalt.err (!%p817_p6)
}
 0x761   :  { %s821_s12 = scalar_lea.hbm %s1060_s2, 128 }
 0x762   :  { %p822_p7 = scmp.ne.s32.totalorder %s1060_s2, %s821_s12  ;;  %p825_p8 = scmp.lt.u32.totalorder %s821_s12, %s1060_s2 }
 0x764   :  { %p827_p9 = pnand %p825_p8, %p822_p7 }
 0x766   :  { %830 = shalt.err (!%p827_p9)
}
 0x767   :  { %484 = dma.vmem_to_hbm [thread:$0]  %s482_s8, 128, %s1060_s2, [#allocation5]  }
 0x768   :  { %835 = dma.done.wait [#allocation5], 128  }
 0x769   :  { %836 = vsyncadd [#allocation5], 4294967168 }
 0x76a   :  { %488 = vsyncpa [#allocation4], 1 }
 0x76b   :  { %489 = vsyncpa [#allocation7], 1 }
 0x76c   :  { %490 = vsyncpa [#allocation5], 1 }

</bundles_post_ra>
